<compile_context>
chip_gen: v7x
topology: tpu7x:2x2x1
jax: 0.10.0
libtpu: 0.0.40
codegen_flags: <defaults>
</compile_context>

<pallas_src>
import functools

import jax
import jax.numpy as jnp
from jax.experimental import pallas as pl
from jax.experimental.pallas import tpu as pltpu


def _round_up(x, m):
    return (x + m - 1) // m * m


def _modulating_power(x, gamma):
    """(1 - p) ** gamma without a transcendental pow for integer gamma."""
    g = float(gamma)
    if g == 0.0:
        return jnp.ones_like(x)
    if g.is_integer() and g > 0:
        # exponentiation by squaring; gamma=2 -> a single x*x
        n = int(g)
        result = None
        base = x
        while n:
            if n & 1:
                result = base if result is None else result * base
            n >>= 1
            if n:
                base = base * base
        return result
    # TODO(synk): non-integer gamma falls back to exp(g*log(x)), clamped at tiny x.
    return jnp.exp(g * jnp.log(jnp.maximum(x, 1e-30)))


def _focal_loss_kernel(gamma, l_size, tile_l, grid_l, per_split,
                       logit_ref, tgt_ref, num_ref, den_ref):
    s = pl.program_id(0)   # parallel split (megacore)
    b = pl.program_id(1)   # batch
    l = pl.program_id(2)   # L-tile within this split

    @pl.when(jnp.logical_and(b == 0, l == 0))
    def _():
        num_ref[...] = jnp.zeros_like(num_ref)
        den_ref[...] = jnp.zeros_like(den_ref)

    logits = logit_ref[...].astype(jnp.float32)       # (1, C, tile_l), f32 upcast in VMEM
    tgt = tgt_ref[...]                                 # (1, 1, tile_l) int32

    # log-softmax statistics along the class (sublane) axis.
    m = jnp.max(logits, axis=1, keepdims=True)         # (1, 1, tile_l)
    e = jnp.exp(logits - m)                             # (1, C, tile_l)
    sumexp = jnp.sum(e, axis=1, keepdims=True)           # (1, 1, tile_l)

    cls = jax.lax.broadcasted_iota(jnp.int32, logits.shape, 1)
    sel = cls == tgt
    picked_logit = jnp.sum(jnp.where(sel, logits, 0.0), axis=1, keepdims=True)
    picked_e = jnp.sum(jnp.where(sel, e, 0.0), axis=1, keepdims=True)

    # cross entropy of the target class; p reused from the softmax numerator
    # (saves the second exp(-logp) on the single-slot EUP).
    logp = m + jnp.log(sumexp) - picked_logit            # (1, 1, tile_l)
    p = picked_e / sumexp
    one_minus_p = jnp.clip(1.0 - p, 0.0, 1.0)             # guard fp rounding p>1
    modulate = _modulating_power(one_minus_p, gamma)

    num_c = modulate * logp
    den_c = modulate

    # Edge tiles (ragged last L tile, or overflow tiles of an uneven split that
    # were clamped onto the last tile) need a validity mask; steady-state tiles
    # accumulate unmasked (no iota/compare/select in the common path).
    gl = s * per_split + l
    is_edge = gl >= grid_l - 1

    @pl.when(jnp.logical_not(is_edge))
    def _():
        num_ref[...] += num_c
        den_ref[...] += den_c

    @pl.when(is_edge)
    def _():
        pos = gl * tile_l + jax.lax.broadcasted_iota(jnp.int32, num_c.shape, 2)
        valid = pos < l_size
        num_ref[...] += jnp.where(valid, num_c, 0.0)
        den_ref[...] += jnp.where(valid, den_c, 0.0)


def _vmem_capacity_bytes():
    try:
        return int(pltpu.get_tpu_info().vmem_capacity_bytes)
    except Exception:
        return 64 << 20   # conservative fallback (v7x per-TensorCore VMEM)


def _choose_tile_l(C, L, itemsize, vmem_budget, target_bytes=2 << 20):
    # sublane padding of the class axis in VMEM (bf16 packs pairs of rows)
    c_pad = _round_up(C, 16 if itemsize == 2 else 8)
    # rough per-lane-element VMEM cost: double-buffered logits + (8-sublane
    # padded) int32 targets, double-buffered f32 num/den blocks, f32 temporaries.
    coef = (2 * (c_pad * itemsize + 8 * 4)
            + 2 * 2 * 8 * 4
            + (2 * _round_up(C, 8) + 16) * 4)
    tl_vmem = (vmem_budget // 2) // coef
    tl_hbm = target_bytes // max(C * itemsize, 1)      # ~2 MiB of real HBM bytes / step
    tl = min(tl_vmem, tl_hbm, _round_up(L, 128))
    return max(128, (tl // 128) * 128)


def _focal_loss_bcl(logits, targets, gamma, *, n_splits=2, tile_l=None):
    """Core kernel launcher. logits: (B, C, L); targets: (B, 1, L) int32."""
    B, C, L = logits.shape
    itemsize = jnp.dtype(logits.dtype).itemsize

    vmem_cap = _vmem_capacity_bytes()
    vmem_budget = vmem_cap // 2
    if tile_l is None:
        tile_l = _choose_tile_l(C, L, itemsize, vmem_budget)
    tile_l = max(128, min(_round_up(int(tile_l), 128), _round_up(L, 128)))

    grid_l = pl.cdiv(L, tile_l)
    n_splits = max(1, int(n_splits))
    per_split = pl.cdiv(grid_l, n_splits)
    n_splits_eff = pl.cdiv(grid_l, per_split)

    # Uneven split: overflow iterations are clamped onto the last real tile
    # (always an in-bounds block) and masked to zero contribution in-kernel.
    has_overflow = n_splits_eff * per_split > grid_l
    if has_overflow:
        def tile_idx(s, l):
            return jnp.minimum(s * per_split + l, grid_l - 1)
    else:
        def tile_idx(s, l):
            return s * per_split + l

    # VMEM limit accounting for sublane padding of C and the int32 target block.
    c_pad = _round_up(C, 16 if itemsize == 2 else 8)
    vmem_needed = (2 * (c_pad * tile_l * itemsize + 8 * tile_l * 4)
                   + 2 * 2 * 8 * tile_l * 4
                   + (2 * _round_up(C, 8) + 16) * tile_l * 4)
    vmem_limit = int(min(max(2 * vmem_needed, 16 << 20), vmem_cap))

    kernel = functools.partial(_focal_loss_kernel, gamma, L, tile_l, grid_l,
                               per_split)

    num, den = pl.pallas_call(
        kernel,
        out_shape=(jax.ShapeDtypeStruct((n_splits_eff, 1, tile_l), jnp.float32),
                   jax.ShapeDtypeStruct((n_splits_eff, 1, tile_l), jnp.float32)),
        grid_spec=pltpu.PrefetchScalarGridSpec(
            num_scalar_prefetch=0,
            grid=(n_splits_eff, B, per_split),
            in_specs=[
                # logits: classes on sublanes, positions lane-dense, native dtype
                pl.BlockSpec((1, C, tile_l), lambda s, b, l: (b, 0, tile_idx(s, l))),
                # targets: one int32 row per position tile
                pl.BlockSpec((1, 1, tile_l), lambda s, b, l: (b, 0, tile_idx(s, l))),
            ],
            out_specs=(
                # per-split lane-dense partial sums, resident across the reduction axes
                pl.BlockSpec((1, 1, tile_l), lambda s, b, l: (s, 0, 0)),
                pl.BlockSpec((1, 1, tile_l), lambda s, b, l: (s, 0, 0)),
            ),
        ),
        compiler_params=pltpu.CompilerParams(
            dimension_semantics=("parallel", "arbitrary", "arbitrary"),
            vmem_limit_bytes=vmem_limit),
    )(logits, targets)

    # final cross-lane/cross-split reduce + divide on tiny arrays in JAX
    return jnp.sum(num) / jnp.sum(den)


def softmax_focal_loss_nchw(logit, target, gamma=2.0, n_splits=2, tile_l=None):
    """PyTorch dense layout: logit (N, C, H, W), target (N, H, W) int."""
    N, C, H, W = logit.shape
    logits3 = logit.reshape(N, C, H * W)                 # pure reshape, no transpose
    tgt3 = target.reshape(N, 1, H * W).astype(jnp.int32)
    return _focal_loss_bcl(logits3, tgt3, gamma, n_splits=n_splits, tile_l=tile_l)


def softmax_focal_loss(logit, target, gamma=2.0, n_splits=2, tile_l=None):
    """logit: (N, C) float (any dtype) or (N, C, H, W); target: matching int."""
    if logit.ndim == 4:
        return softmax_focal_loss_nchw(logit, target, gamma, n_splits, tile_l)
    N, C = logit.shape
    # class-major layout so rows land on the lane axis inside the kernel; this
    # transpose is a single extra pass over a (N, C) array (cheap for small C).
    logits3 = jnp.transpose(logit, (1, 0)).reshape(1, C, N)
    tgt3 = target.reshape(1, 1, N).astype(jnp.int32)
    return _focal_loss_bcl(logits3, tgt3, gamma, n_splits=n_splits, tile_l=tile_l)


def softmax_focal_loss_ref(logit, target, gamma=2.0):
    """Pure-JAX reference matching the PyTorch module ((N, C) rows)."""
    logit = logit.astype(jnp.float32)
    lse = jax.nn.logsumexp(logit, axis=-1)
    picked = jnp.take_along_axis(logit, target[:, None], axis=-1)[:, 0]
    logp = lse - picked
    p = jnp.exp(-logp)
    modulate = (1.0 - p) ** gamma
    return jnp.sum(modulate * logp / jnp.sum(modulate))


if __name__ == "__main__":
    key = jax.random.PRNGKey(0)
    k1, k2, k3, k4, k5, k6 = jax.random.split(key, 6)

    # dense (NCHW) case: batch=2, channels=4, spatial=16x16
    x = jax.random.normal(k1, (2, 4, 16, 16), dtype=jnp.float32) * 3.0
    t = jax.random.randint(k2, (2, 16, 16), 0, 4, dtype=jnp.int32)
    loss_dense = jax.block_until_ready(softmax_focal_loss_nchw(x, t, gamma=2.0))
    rows = jnp.transpose(x, (0, 2, 3, 1)).reshape(-1, 4)
    ref_dense = softmax_focal_loss_ref(rows, t.reshape(-1), gamma=2.0)
    assert jnp.allclose(loss_dense, ref_dense, rtol=1e-5, atol=1e-5), (loss_dense, ref_dense)

    # ragged (N, C) case: row count not a multiple of the 128-lane tile
    logit2 = jax.random.normal(k3, (37, 21), dtype=jnp.float32) * 3.0
    target2 = jax.random.randint(k4, (37,), 0, 21, dtype=jnp.int32)
    loss2 = jax.block_until_ready(softmax_focal_loss(logit2, target2, gamma=2.0))
    ref2 = softmax_focal_loss_ref(logit2, target2, gamma=2.0)
    assert jnp.allclose(loss2, ref2, rtol=1e-5, atol=1e-5), (loss2, ref2)

    # larger NCHW case with a forced small tile: exercises multi-tile,
    # multi-split (megacore) accumulation incl. ragged + clamped overflow tiles.
    x3 = jax.random.normal(k5, (2, 4, 64, 64), dtype=jnp.float32) * 3.0
    t3 = jax.random.randint(k6, (2, 64, 64), 0, 4, dtype=jnp.int32)
    loss3 = jax.block_until_ready(
        softmax_focal_loss_nchw(x3, t3, gamma=2.0, n_splits=2, tile_l=384))
    rows3 = jnp.transpose(x3, (0, 2, 3, 1)).reshape(-1, 4)
    ref3 = softmax_focal_loss_ref(rows3, t3.reshape(-1), gamma=2.0)
    assert jnp.allclose(loss3, ref3, rtol=1e-4, atol=1e-4), (loss3, ref3)

    print("KERNEL_OK")
</pallas_src>

<mosaic_0001>
module attributes {stable_mosaic.version = 11 : i64} {
  func.func @_focal_loss_kernel(%arg0: i32, %arg1: i32, %arg2: i32, %arg3: memref<1x4x256xf32, #tpu.memory_space<vmem>>, %arg4: memref<1x1x256xi32, #tpu.memory_space<vmem>>, %arg5: memref<1x1x256xf32, #tpu.memory_space<vmem>>, %arg6: memref<1x1x256xf32, #tpu.memory_space<vmem>>) attributes {dimension_semantics = [#tpu.dimension_semantics<parallel>, #tpu.dimension_semantics<arbitrary>, #tpu.dimension_semantics<arbitrary>], iteration_bounds = array<i64: 1, 2, 1>, scalar_prefetch = 0 : i64, scratch_operands = 0 : i64, tpu.core_type = #tpu.core_type<tc>, window_params = [{transform_indices = @transform_0, window_bounds = array<i64: 1, 4, 256>}, {transform_indices = @transform_1, window_bounds = array<i64: 1, 1, 256>}, {transform_indices = @transform_2, window_bounds = array<i64: 1, 1, 256>}, {transform_indices = @transform_3, window_bounds = array<i64: 1, 1, 256>}]} {
    %c0_i32 = arith.constant 0 : i32
    %0 = arith.cmpi eq, %arg1, %c0_i32 : i32
    %c0_i32_0 = arith.constant 0 : i32
    %1 = arith.cmpi eq, %arg2, %c0_i32_0 : i32
    %2 = arith.andi %0, %1 : i1
    %3 = arith.extui %2 : i1 to i32
    %c0_i32_1 = arith.constant 0 : i32
    %4 = arith.cmpi ne, %3, %c0_i32_1 : i32
    scf.if %4 {
      %cst_18 = arith.constant 0.000000e+00 : f32
      %45 = vector.broadcast %cst_18 : f32 to vector<1x1x256xf32>
      %c0_19 = arith.constant 0 : index
      %c0_20 = arith.constant 0 : index
      %c0_21 = arith.constant 0 : index
      %46 = vector.load %arg5[%c0_19, %c0_20, %c0_21] : memref<1x1x256xf32, #tpu.memory_space<vmem>>, vector<1x1x256xf32>
      tpu.vector_store %arg5[%c0_19, %c0_20, %c0_21], %45 {strides = array<i32>} : memref<1x1x256xf32, #tpu.memory_space<vmem>>, vector<1x1x256xf32>,
      %cst_22 = arith.constant 0.000000e+00 : f32
      %47 = vector.broadcast %cst_22 : f32 to vector<1x1x256xf32>
      %c0_23 = arith.constant 0 : index
      %c0_24 = arith.constant 0 : index
      %c0_25 = arith.constant 0 : index
      %48 = vector.load %arg6[%c0_23, %c0_24, %c0_25] : memref<1x1x256xf32, #tpu.memory_space<vmem>>, vector<1x1x256xf32>
      tpu.vector_store %arg6[%c0_23, %c0_24, %c0_25], %47 {strides = array<i32>} : memref<1x1x256xf32, #tpu.memory_space<vmem>>, vector<1x1x256xf32>,
    } else {
    }
    %c0 = arith.constant 0 : index
    %c0_2 = arith.constant 0 : index
    %c0_3 = arith.constant 0 : index
    %5 = vector.load %arg3[%c0, %c0_2, %c0_3] : memref<1x4x256xf32, #tpu.memory_space<vmem>>, vector<1x4x256xf32>
    %c0_4 = arith.constant 0 : index
    %c0_5 = arith.constant 0 : index
    %c0_6 = arith.constant 0 : index
    %6 = vector.load %arg4[%c0_4, %c0_5, %c0_6] : memref<1x1x256xi32, #tpu.memory_space<vmem>>, vector<1x1x256xi32>
    %cst = arith.constant dense<0xFF800000> : vector<1x256xf32>
    %7 = vector.multi_reduction <maximumf>, %5, %cst [1] : vector<1x4x256xf32> to vector<1x256xf32>
    %8 = vector.shape_cast %7 : vector<1x256xf32> to vector<1x1x256xf32>
    %9 = vector.broadcast %8 : vector<1x1x256xf32> to vector<1x4x256xf32>
    %10 = arith.subf %5, %9 : vector<1x4x256xf32>
    %11 = math.exp %10 : vector<1x4x256xf32>
    %cst_7 = arith.constant dense<0.000000e+00> : vector<1x256xf32>
    %12 = vector.multi_reduction <add>, %11, %cst_7 [1] : vector<1x4x256xf32> to vector<1x256xf32>
    %13 = vector.shape_cast %12 : vector<1x256xf32> to vector<1x1x256xf32>
    %14 = tpu.iota {dimensions = array<i32: 1>} : vector<1x4x256xi32>
    %15 = vector.broadcast %6 : vector<1x1x256xi32> to vector<1x4x256xi32>
    %16 = arith.cmpi eq, %14, %15 : vector<1x4x256xi32>
    %cst_8 = arith.constant 0.000000e+00 : f32
    %17 = vector.broadcast %cst_8 : f32 to vector<1x4x256xf32>
    %18 = arith.select %16, %5, %17 : vector<1x4x256xi1>, vector<1x4x256xf32>
    %cst_9 = arith.constant dense<0.000000e+00> : vector<1x256xf32>
    %19 = vector.multi_reduction <add>, %18, %cst_9 [1] : vector<1x4x256xf32> to vector<1x256xf32>
    %20 = vector.shape_cast %19 : vector<1x256xf32> to vector<1x1x256xf32>
    %cst_10 = arith.constant 0.000000e+00 : f32
    %21 = vector.broadcast %cst_10 : f32 to vector<1x4x256xf32>
    %22 = arith.select %16, %11, %21 : vector<1x4x256xi1>, vector<1x4x256xf32>
    %cst_11 = arith.constant dense<0.000000e+00> : vector<1x256xf32>
    %23 = vector.multi_reduction <add>, %22, %cst_11 [1] : vector<1x4x256xf32> to vector<1x256xf32>
    %24 = vector.shape_cast %23 : vector<1x256xf32> to vector<1x1x256xf32>
    %25 = math.log %13 : vector<1x1x256xf32>
    %26 = arith.addf %8, %25 : vector<1x1x256xf32>
    %27 = arith.subf %26, %20 : vector<1x1x256xf32>
    %28 = arith.divf %24, %13 : vector<1x1x256xf32>
    %cst_12 = arith.constant 1.000000e+00 : f32
    %29 = vector.broadcast %cst_12 : f32 to vector<1x1x256xf32>
    %30 = arith.subf %29, %28 : vector<1x1x256xf32>
    %cst_13 = arith.constant 0.000000e+00 : f32
    %cst_14 = arith.constant 1.000000e+00 : f32
    %31 = vector.broadcast %cst_13 : f32 to vector<1x1x256xf32>
    %32 = arith.maximumf %31, %30 : vector<1x1x256xf32>
    %33 = vector.broadcast %cst_14 : f32 to vector<1x1x256xf32>
    %34 = arith.minimumf %33, %32 : vector<1x1x256xf32>
    %35 = arith.mulf %34, %34 : vector<1x1x256xf32>
    %36 = arith.mulf %35, %27 : vector<1x1x256xf32>
    %c1_i32 = arith.constant 1 : i32
    %37 = arith.muli %arg0, %c1_i32 : i32
    %38 = arith.addi %37, %arg2 : i32
    %c0_i32_15 = arith.constant 0 : i32
    %39 = arith.cmpi sge, %38, %c0_i32_15 : i32
    %true = arith.constant true
    %40 = arith.xori %39, %true : i1
    %41 = arith.extui %40 : i1 to i32
    %c0_i32_16 = arith.constant 0 : i32
    %42 = arith.cmpi ne, %41, %c0_i32_16 : i32
    scf.if %42 {
      %c0_18 = arith.constant 0 : index
      %c0_19 = arith.constant 0 : index
      %c0_20 = arith.constant 0 : index
      %45 = vector.load %arg5[%c0_18, %c0_19, %c0_20] : memref<1x1x256xf32, #tpu.memory_space<vmem>>, vector<1x1x256xf32>
      %46 = arith.addf %45, %36 : vector<1x1x256xf32>
      %c0_21 = arith.constant 0 : index
      %c0_22 = arith.constant 0 : index
      %c0_23 = arith.constant 0 : index
      %47 = vector.load %arg5[%c0_21, %c0_22, %c0_23] : memref<1x1x256xf32, #tpu.memory_space<vmem>>, vector<1x1x256xf32>
      tpu.vector_store %arg5[%c0_21, %c0_22, %c0_23], %46 {strides = array<i32>} : memref<1x1x256xf32, #tpu.memory_space<vmem>>, vector<1x1x256xf32>,
      %c0_24 = arith.constant 0 : index
      %c0_25 = arith.constant 0 : index
      %c0_26 = arith.constant 0 : index
      %48 = vector.load %arg6[%c0_24, %c0_25, %c0_26] : memref<1x1x256xf32, #tpu.memory_space<vmem>>, vector<1x1x256xf32>
      %49 = arith.addf %48, %35 : vector<1x1x256xf32>
      %c0_27 = arith.constant 0 : index
      %c0_28 = arith.constant 0 : index
      %c0_29 = arith.constant 0 : index
      %50 = vector.load %arg6[%c0_27, %c0_28, %c0_29] : memref<1x1x256xf32, #tpu.memory_space<vmem>>, vector<1x1x256xf32>
      tpu.vector_store %arg6[%c0_27, %c0_28, %c0_29], %49 {strides = array<i32>} : memref<1x1x256xf32, #tpu.memory_space<vmem>>, vector<1x1x256xf32>,
    } else {
    }
    %43 = arith.extui %39 : i1 to i32
    %c0_i32_17 = arith.constant 0 : i32
    %44 = arith.cmpi ne, %43, %c0_i32_17 : i32
    scf.if %44 {
      %c256_i32 = arith.constant 256 : i32
      %45 = arith.muli %38, %c256_i32 : i32
      %46 = tpu.iota {dimensions = array<i32: 2>} : vector<1x1x256xi32>
      %47 = vector.broadcast %45 : i32 to vector<1x1x256xi32>
      %48 = arith.addi %47, %46 : vector<1x1x256xi32>
      %c256_i32_18 = arith.constant 256 : i32
      %49 = vector.broadcast %c256_i32_18 : i32 to vector<1x1x256xi32>
      %50 = arith.cmpi slt, %48, %49 : vector<1x1x256xi32>
      %c0_19 = arith.constant 0 : index
      %c0_20 = arith.constant 0 : index
      %c0_21 = arith.constant 0 : index
      %51 = vector.load %arg5[%c0_19, %c0_20, %c0_21] : memref<1x1x256xf32, #tpu.memory_space<vmem>>, vector<1x1x256xf32>
      %cst_22 = arith.constant 0.000000e+00 : f32
      %52 = vector.broadcast %cst_22 : f32 to vector<1x1x256xf32>
      %53 = arith.select %50, %36, %52 : vector<1x1x256xi1>, vector<1x1x256xf32>
      %54 = arith.addf %51, %53 : vector<1x1x256xf32>
      %c0_23 = arith.constant 0 : index
      %c0_24 = arith.constant 0 : index
      %c0_25 = arith.constant 0 : index
      %55 = vector.load %arg5[%c0_23, %c0_24, %c0_25] : memref<1x1x256xf32, #tpu.memory_space<vmem>>, vector<1x1x256xf32>
      tpu.vector_store %arg5[%c0_23, %c0_24, %c0_25], %54 {strides = array<i32>} : memref<1x1x256xf32, #tpu.memory_space<vmem>>, vector<1x1x256xf32>,
      %c0_26 = arith.constant 0 : index
      %c0_27 = arith.constant 0 : index
      %c0_28 = arith.constant 0 : index
      %56 = vector.load %arg6[%c0_26, %c0_27, %c0_28] : memref<1x1x256xf32, #tpu.memory_space<vmem>>, vector<1x1x256xf32>
      %cst_29 = arith.constant 0.000000e+00 : f32
      %57 = vector.broadcast %cst_29 : f32 to vector<1x1x256xf32>
      %58 = arith.select %50, %35, %57 : vector<1x1x256xi1>, vector<1x1x256xf32>
      %59 = arith.addf %56, %58 : vector<1x1x256xf32>
      %c0_30 = arith.constant 0 : index
      %c0_31 = arith.constant 0 : index
      %c0_32 = arith.constant 0 : index
      %60 = vector.load %arg6[%c0_30, %c0_31, %c0_32] : memref<1x1x256xf32, #tpu.memory_space<vmem>>, vector<1x1x256xf32>
      tpu.vector_store %arg6[%c0_30, %c0_31, %c0_32], %59 {strides = array<i32>} : memref<1x1x256xf32, #tpu.memory_space<vmem>>, vector<1x1x256xf32>,
    } else {
    }
    return
  }
  func.func @transform_0(%arg0: i32, %arg1: i32, %arg2: i32) -> (i32, i32, i32) {
    %c1_i32 = arith.constant 1 : i32
    %0 = arith.muli %arg0, %c1_i32 : i32
    %1 = arith.addi %0, %arg2 : i32
    %c0_i32 = arith.constant 0 : i32
    %c0_i32_0 = arith.constant 0 : i32
    return %arg1, %c0_i32, %1 : i32, i32, i32
  }
  func.func @transform_1(%arg0: i32, %arg1: i32, %arg2: i32) -> (i32, i32, i32) {
    %c1_i32 = arith.constant 1 : i32
    %0 = arith.muli %arg0, %c1_i32 : i32
    %1 = arith.addi %0, %arg2 : i32
    %c0_i32 = arith.constant 0 : i32
    %c0_i32_0 = arith.constant 0 : i32
    return %arg1, %c0_i32, %1 : i32, i32, i32
  }
  func.func @transform_2(%arg0: i32, %arg1: i32, %arg2: i32) -> (i32, i32, i32) {
    %c0_i32 = arith.constant 0 : i32
    %c0_i32_0 = arith.constant 0 : i32
    %c0_i32_1 = arith.constant 0 : i32
    return %arg0, %c0_i32, %c0_i32_0 : i32, i32, i32
  }
  func.func @transform_3(%arg0: i32, %arg1: i32, %arg2: i32) -> (i32, i32, i32) {
    %c0_i32 = arith.constant 0 : i32
    %c0_i32_0 = arith.constant 0 : i32
    %c0_i32_1 = arith.constant 0 : i32
    return %arg0, %c0_i32, %c0_i32_0 : i32, i32, i32
  }
}

</mosaic_0001>

<bundles_post_ra>
// kernel: tpu_custom_call.1
= control target key start
LH: loop header
LB: loop body
LE: loop exit
PB: predicated region body
PF: predicated region fallthrough
CT: control target
= control target key end

     0   :  { %9 = vsyncpa [#allocation3], 0  ;;  %s1195_s0 = inlined_call_operand.hbm [shape: f32[2,4,256], index: 0, kind: input, shape index: {}]   ;;  %s1196_s1 = inlined_call_operand.hbm [shape: s32[2,1,256], index: 1, kind: input, shape index: {}]   ;;  %s1197_s2 = inlined_call_operand.hbm [shape: f32[1,1,256], index: 2, kind: output, shape index: {0}]   ;;  %s1198_s3 = inlined_call_operand.hbm [shape: f32[1,1,256], index: 3, kind: output, shape index: {1}]  }
   0x1   :  { %11 = vsyncpa [#allocation3 + $0x1], 0 }
   0x2   :  { %12 = vsyncpa [#allocation6], 0 }
   0x3   :  { %14 = vsyncpa [#allocation6 + $0x1], 0 }
   0x4   :  { %15 = vsyncpa [#allocation4], 0 }
   0x5   :  { %16 = vsyncpa [#allocation9], 0  ;;  %s938_s12 = smov 0   ;;  %s940_s13 = smov 0  }
   0x6   :  { %s942_s14 = smov 0   ;;  %s944_s15 = smov 0  }
   0x7   :  { %s946_s16 = smov 0   ;;  %s948_s17 = smov 0  }
   0x8 LB: > { %s627_s18 = sadd.s32 4294967295, %s910_s17   ;;  %s37_s19 = sadd.s32 1, %s906_s16  ;;  %s910_s17 = sphi %s948_s17, %s22_s17   ;;  %s906_s16 = sphi %s946_s16, %s1215_s16   ;;  %s902_s15 = sphi %s944_s15, %s1214_s15   ;;  %s898_s14 = sphi %s942_s14, %s1213_s14   ;;  %s894_s13 = sphi %s940_s13, %s1212_s13   ;;  %s890_s12 = sphi %s938_s12, %s1211_s12  }
   0x9   : > { %p39_p0 = scmp.ge.s32.totalorder %s37_s19, 2  ;;  %s52_s20 = sadd.s32 1, %s898_s14 }
   0xa   : > { %p59_p1 = scmp.ne.s32.totalorder %s898_s14, %s894_s13  ;;  %p60_p2 = scmp.eq.s32.totalorder %s910_s17, 0 }
   0xb   : > { %s1217_s19 = smov (%p39_p0, %s37_s19), 0  ;;  %p65_p4 = scmp.ne.s32.totalorder %s894_s13, %s890_s12 }
   0xc   : > { %p974_p3 = por %p60_p2, %p59_p1  ;;  %s47_s22 = ssub.s32 %s906_s16, %s1217_s19 }
   0xd   : > { %p66_p5 = scmp.eq.s32.totalorder %s627_s18, 0  ;;  %p50_p6 = scmp.eq.s32.totalorder %s47_s22, 0 }
   0xe   : > { %p668_p8 = scmp.lt.s32.totalorder %s910_s17, 2  ;;  %s992_s25 = sand.u32 1, %s898_s14  }
   0xf   : > { %p983_p7 = por %p66_p5, %p65_p4  ;;  %s646_s26 = sshll.u32 %s906_s16, 7 }
  0x10   : > { %s989_s24 = scalar_select %p50_p6, %s898_s14, %s52_s20  }
  0x11   : > { %s1201_s23 = scalar_select %p983_p7, 1, 0 }
  0x12   : > { %s630_s27 = sshll.u32 %s992_s25, 3  ;;  %s999_s30 = scalar_lea.hbm %s1195_s0, %s646_s26 }
  0x13   : > { %s175_s4 = scalar_lea.vmem [#allocation2], %s630_s27  ;;  %p1003_p9 = pnand %p668_p8, %p974_p3 }
  0x14   : > { %s186_s5 = sshll.u32 %s175_s4, 4  ;;  %s172_s7 = scalar_lea.sflag [#allocation3], %s992_s25  ;;  %s1007_s5 = int_to_ptr.vmem [resolvable:$true] %s186_s5 }
  0x15   : > { %s736_s8 = scalar_lea.hbm %s999_s30, 128  ;;  %p738_p13 = pneg %p1003_p9 }
  0x16   : > { %p737_p12 = scmp.ne.s32.totalorder %s999_s30, %s736_s8  ;;  %s741_s11 = scalar_lea.hbm %s1195_s0, 256 }
  0x17   : > { %p742_p2 = scmp.lt.u32.totalorder %s999_s30, %s1195_s0  ;;  %p743_p3 = scmp.lt.u32.totalorder %s741_s11, %s736_s8 }
  0x18   : > { %p739_p0 = pnand %p738_p13, %p737_p12  ;;  %p745_p5 = scmp.lt.u32.totalorder %s736_s8, %s999_s30 }
  0x19   : > { %p744_p4 = por %p743_p3, %p742_p2 }
  0x1a   : > { %p740_p1 = pneg %p739_p0 }
  0x1b   : > { %p746_p6 = por %p745_p5, %p744_p4 }
  0x1d   : > { %p747_p8 = pnand %p746_p6, %p740_p1 }
  0x1f   : > { %750 = shalt.err (!%p747_p8)
}
  0x20   : > { %s751_s21 = scalar_lea.vmem %s1007_s5, 128  ;;  %s912_s22 = smov [#allocation2]  }
  0x21   : > { %p752_p12 = scmp.ne.s32.totalorder %s1007_s5, %s751_s21  ;;  %s756_s26 = sshll.u32 %s912_s22, 4  ;;  %s757_s26 = int_to_ptr.vmem [resolvable:$false] %s756_s26 }
  0x22   : > { %s758_s27 = scalar_lea.vmem %s757_s26, 256  ;;  %p759_p11 = scmp.lt.s32.totalorder %s1007_s5, %s757_s26 }
  0x23   : > { %p754_p0 = pnand %p752_p12, %p738_p13  ;;  %p760_p2 = scmp.lt.s32.totalorder %s758_s27, %s751_s21 }
  0x25   : > { %p755_p10 = pneg %p754_p0  ;;  %p761_p3 = por %p760_p2, %p759_p11 }
  0x27   : > { %p762_p4 = pnand %p761_p3, %p755_p10 }
  0x29   : > { %765 = shalt.err (!%p762_p4)
}
  0x2a   : > { %664 = dma.hbm_to_vmem [thread:$0]  (!%p1003_p9), %s999_s30, 128, %s1007_s5, %s172_s7  }
  0x2b   : > { %p1203_p1 = scmp.lt.s32.totalorder %s910_s17, 3  ;;  %p1204_p5 = scmp.ge.s32.totalorder %s910_s17, 1 }
  0x2c   : > { %s633_s29 = sshll.u32 %s992_s25, 1  ;;  %s647_s4 = sshll.u32 %s906_s16, 5 }
  0x2d   : > { %p1041_p6 = pnand %p1204_p5, %p1203_p1  ;;  %s1050_s10 = scalar_lea.hbm %s1196_s1, %s647_s4 }
  0x2e   : > { %s197_s11 = scalar_lea.vmem [#allocation5], %s633_s29  ;;  %s194_s30 = scalar_lea.sflag [#allocation6], %s992_s25 }
  0x2f   : > { %s1205_s28 = scalar_select %p1041_p6, 1, 0 }
  0x30   : > { %s208_s12 = sshll.u32 %s197_s11, 4  ;;  %s766_s5 = scalar_lea.hbm %s1050_s10, 32  ;;  %s209_s12 = int_to_ptr.vmem [resolvable:$true] %s208_s12 }
  0x31   : > { %p767_p10 = scmp.ne.s32.totalorder %s1050_s10, %s766_s5  ;;  %s771_s21 = scalar_lea.hbm %s1196_s1, 64 }
  0x32   : > { %p772_p12 = scmp.lt.u32.totalorder %s1050_s10, %s1196_s1  ;;  %p773_p0 = scmp.lt.u32.totalorder %s771_s21, %s766_s5 }
  0x33   : > { %p769_p11 = pnand %p767_p10, %p738_p13  ;;  %p775_p3 = scmp.lt.u32.totalorder %s766_s5, %s1050_s10 }
  0x34   : > { %p774_p2 = por %p773_p0, %p772_p12 }
  0x35   : > { %p770_p8 = pneg %p769_p11 }
  0x36   : > { %p776_p4 = por %p775_p3, %p774_p2 }
  0x38   : > { %p777_p1 = pnand %p776_p4, %p770_p8 }
  0x3a   : > { %780 = shalt.err (!%p777_p1)
}
  0x3b   : > { %s781_s25 = scalar_lea.vmem %s209_s12, 32  ;;  %s913_s27 = smov [#allocation5]  }
  0x3c   : > { %p782_p5 = scmp.ne.s32.totalorder %s209_s12, %s781_s25  ;;  %s786_s29 = sshll.u32 %s913_s27, 4  ;;  %s787_s29 = int_to_ptr.vmem [resolvable:$false] %s786_s29 }
  0x3d   : > { %s788_s4 = scalar_lea.vmem %s787_s29, 64  ;;  %p789_p7 = scmp.lt.s32.totalorder %s209_s12, %s787_s29 }
  0x3e   : > { %p784_p10 = pnand %p782_p5, %p738_p13  ;;  %p790_p6 = scmp.lt.s32.totalorder %s788_s4, %s781_s25 }
  0x40   : > { %p785_p11 = pneg %p784_p10  ;;  %p791_p0 = por %p790_p6, %p789_p7 }
  0x42   : > { %p792_p12 = pnand %p791_p0, %p785_p11 }
  0x44   : > { %795 = shalt.err (!%p792_p12)
}
  0x45   : > { %667 = dma.hbm_to_vmem [thread:$0]  (!%p1003_p9), %s1050_s10, 32, %s209_s12, %s194_s30  }
  0x46   : > { %p1206_p8 = scmp.ne.s32.totalorder %s1205_s28, 0 }
  0x47   : > { %s219_s8 = sand.u32 (!%p1206_p8), 1, %s894_s13   ;;  %p1207_p13 = scmp.ne.s32.totalorder (!%p1206_p8), %s1201_s23, 0 }
  0x48   : > { %217 = sbr.rel (%p1206_p8) target bundleno = 208 (0xd0), region = 28  ;;  %s637_s9 = sshll.u32 (!%p1206_p8), %s219_s8, 3 }
  0x49   : > { %s220_s11 = scalar_lea.sflag (!%p1206_p8), [#allocation3], %s219_s8  ;;  %s223_s5 = scalar_lea.vmem (!%p1206_p8), [#allocation2], %s637_s9 }
  0x4f   : > { %873 = dma.done.wait (%p1207_p13), %s220_s11, 128  }
  0x50   : > { %875 = vsyncadd (%p1207_p13), %s220_s11, 4294967168  ;;  %s638_s7 = sshll.u32 %s219_s8, 1  ;;  %s229_s20 = scalar_lea.sflag [#allocation6], %s219_s8 }
  0x51   : > { %s1079_s6 = scalar_lea.vmem [#allocation5], %s638_s7 }
  0x52   : > { %877 = dma.done.wait (%p1207_p13), %s229_s20, 32  }
  0x53   : > { %879 = vsyncadd (%p1207_p13), %s229_s20, 4294967264  ;;  %p259_p7 = scmp.eq.s32.totalorder %s902_s15, 0 }
  0x54   : > { %v265_v0 = vlaneseq (%p259_p7)  ;;  %v914_v1 = vmov (%p259_p7), 0.0  }
  0x55   : > { %264 = sbr.rel (!%p259_p7) target bundleno = 92 (0x5c), region = 40 }
  0x56   : > { %vm267_vm0 = vcmp.lt.s32.totalorder (%p259_p7), %v265_v0, 256 }
  0x57   : > { %269 = vst.msk [vmem:[#allocation7] sm:$0x3] (%p259_p7), %vm267_vm0, %v914_v1  ;;  %270 = vst.msk [vmem:[#allocation8] sm:$0x3] (%p259_p7), %vm267_vm0, %v914_v1 }
  0x5c PF: > { %v271_v2 = vld [vmem:[%s223_s5] sm:$0xff]  ;;  %vm276_vm1 = vcmask 1043456   ;;  %v315_v18 = vlaneseq  ;;  %v272_v24 = vld [vmem:[%s1079_s6] sm:$0x3]  ;;  %s916_s15 = smov [#allocation8]   ;;  %p1118_p9 = scmp.eq.s32.totalorder %s627_s18, 1 }
  0x5d   : > { %v274_v3 = vcombine.high %v271_v2, %v271_v2  ;;  %v277_v4 = vsel %vm276_vm1, %v271_v2, -inf  ;;  %s519_s23 = sshll.u32 %s916_s15, 4  ;;  %s917_s10 = smov [#allocation7]   ;;  %s520_s23 = int_to_ptr.vmem [resolvable:$true] %s519_s23 }
  0x5e   : > { %v278_v5 = vrot.slane %v277_v4, 4  ;;  %v1095_v21 = vshrl.u32 %v315_v18, 7  ;;  %vm1112_vm4 = vcmp.lt.s32.totalorder %v315_v18, 256  ;;  %s505_s12 = sshll.u32 %s917_s10, 4  ;;  %s796_s30 = scalar_lea.vmem %s520_s23, 32  ;;  %s1124_s12 = int_to_ptr.vmem [resolvable:$true] %s505_s12 }
  0x5f   : > { %v284_v6 = vsel %vm276_vm1, %v274_v3, -inf  ;;  %p797_p6 = scmp.ne.s32.totalorder %s520_s23, %s796_s30  ;;  %p803_p4 = scmp.lt.s32.totalorder %s520_s23, %s520_s23 }
  0x60   : > { %v279_v7 = vmax.f32 %v277_v4, %v278_v5  ;;  %v285_v8 = vrot.slane %v284_v6, 4  ;;  %v319_v23 = vsub.s32 0, %v1095_v21  ;;  %v323_v25 = vsub.s32 1, %v1095_v21  ;;  %p804_p1 = scmp.lt.s32.totalorder %s796_s30, %s796_s30 }
  0x61   : > { %p798_p2 = pnand %p797_p6, %p1118_p9 }
  0x62   : > { %v280_v9 = vrot.slane %v279_v7, 2  ;;  %v286_v10 = vmax.f32 %v284_v6, %v285_v8  ;;  %v320_v26 = vrot.slane %v272_v24, %v319_v23  ;;  %v324_v27 = vrot.slane %v272_v24, %v323_v25  ;;  %p805_p5 = por %p804_p1, %p803_p4 }
  0x63   : > { %p799_p3 = pneg %p798_p2 }
  0x64   : > { %v281_v11 = vmax.f32 %v279_v7, %v280_v9  ;;  %v287_v12 = vrot.slane %v286_v10, 2  ;;  %vm325_vm2 = vcmp.eq.s32.totalorder %v1095_v21, %v320_v26  ;;  %vm326_vm3 = vcmp.eq.s32.totalorder %v1095_v21, %v324_v27 }
  0x65   : > { %v327_v33 = vsel %vm325_vm2, %v271_v2, 0.0  ;;  %v328_v40 = vsel %vm326_vm3, %v274_v3, 0.0  ;;  %p806_p10 = pnand %p805_p5, %p799_p3 }
  0x66   : > { %v282_v13 = vrot.slane %v281_v11, 1  ;;  %v288_v14 = vmax.f32 %v286_v10, %v287_v12  ;;  %v329_v42 = vsel %vm276_vm1, %v327_v33, 0.0  ;;  %v336_v47 = vsel %vm276_vm1, %v328_v40, 0.0 }
  0x67   : > { %v330_v50 = vrot.slane %v329_v42, 4  ;;  %v337_v54 = vrot.slane %v336_v47, 4 }
  0x68   : > { %v1088_v15 = vmax.f32 %v281_v11, %v282_v13  ;;  %v289_v16 = vrot.slane %v288_v14, 1 }
  0x69   : > { %v331_v58 = vadd.f32 %v330_v50, %v329_v42  ;;  %v338_v61 = vadd.f32 %v337_v54, %v336_v47 }
  0x6a   : > { %v1090_v17 = vmax.f32 %v288_v14, %v289_v16 }
  0x6b   : > { %v332_v63 = vrot.slane %v331_v58, 2  ;;  %v339_v1 = vrot.slane %v338_v61, 2 }
  0x6c   : > { %v293_v19 = vcombine.low %v1088_v15, %v1090_v17 }
  0x6d   : > { %v333_v3 = vadd.f32 %v332_v63, %v331_v58  ;;  %v340_v5 = vadd.f32 %v339_v1, %v338_v61 }
  0x6e   : > { %v295_v20 = vsub.f32 %v271_v2, %v293_v19 }
  0x6f   : > { %v334_v8 = vrot.slane %v333_v3, 1  ;;  %v341_v13 = vrot.slane %v340_v5, 1 }
  0x70   : > { %v296_v22 = vmul.f32 1.442695, %v295_v20  ;;  %v915_v20 = vmov 1966171168  }
  0x71   : > { %v335_v23 = vadd.f32 %v334_v8, %v333_v3  ;;  %v342_v27 = vadd.f32 %v341_v13, %v340_v5 }
  0x72   : > { %726 = vpow2.f32 %v296_v22  ;;  %v452_v22 = vunpack.c.l.s4 %v915_v20 }
  0x7c   : > { %v727_v28 = vpop.eup %726 }
  0x7d   : > { %v299_v29 = vcombine.high %v727_v28, %v727_v28  ;;  %v301_v30 = vsel %vm276_vm1, %v727_v28, 0.0  ;;  %v343_v31 = vsel %vm325_vm2, %v727_v28, 0.0 }
  0x7e   : > { %v302_v32 = vrot.slane %v301_v30, 4  ;;  %v345_v34 = vsel %vm276_vm1, %v343_v31, 0.0 }
  0x7f   : > { %v308_v35 = vsel %vm276_vm1, %v299_v29, 0.0  ;;  %v344_v36 = vsel %vm326_vm3, %v299_v29, 0.0  ;;  %v346_v37 = vrot.slane %v345_v34, 4 }
  0x80   : > { %v303_v38 = vadd.f32 %v302_v32, %v301_v30  ;;  %v309_v39 = vrot.slane %v308_v35, 4  ;;  %v352_v41 = vsel %vm276_vm1, %v344_v36, 0.0 }
  0x81   : > { %v353_v43 = vrot.slane %v352_v41, 4  ;;  %v347_v46 = vadd.f32 %v346_v37, %v345_v34  ;;  %v453_v34 = vunpack.c.0.s8 %v452_v22 }
  0x82   : > { %v304_v44 = vrot.slane %v303_v38, 2  ;;  %v310_v45 = vadd.f32 %v309_v39, %v308_v35 }
  0x83   : > { %v354_v51 = vadd.f32 %v353_v43, %v352_v41  ;;  %v348_v55 = vrot.slane %v347_v46, 2  ;;  %v456_v40 = vsub.s32 %v453_v34, %v1095_v21 }
  0x84   : > { %v305_v48 = vadd.f32 %v304_v44, %v303_v38  ;;  %v311_v49 = vrot.slane %v310_v45, 2  ;;  %v472_v44 = vld [vmem:[#allocation8] sm:$0x3] }
  0x85   : > { %v355_v59 = vrot.slane %v354_v51, 2  ;;  %v349_v62 = vadd.f32 %v348_v55, %v347_v46  ;;  %v445_v46 = vld [vmem:[#allocation7] sm:$0x3] }
  0x86   : > { %v306_v52 = vrot.slane %v305_v48, 1  ;;  %v312_v53 = vadd.f32 %v311_v49, %v310_v45 }
  0x87   : > { %v356_v0 = vadd.f32 %v355_v59, %v354_v51  ;;  %v350_v2 = vrot.slane %v349_v62, 1 }
  0x88   : > { %v307_v56 = vadd.f32 %v306_v52, %v305_v48  ;;  %v313_v57 = vrot.slane %v312_v53, 1 }
  0x89   : > { %v357_v4 = vrot.slane %v356_v0, 1  ;;  %v351_v6 = vadd.f32 %v350_v2, %v349_v62 }
  0x8a   : > { %v314_v60 = vadd.f32 %v313_v57, %v312_v53  ;;  %728 = vlog2.f32 %v307_v56 }
  0x8b   : > { %730 = vrcp.f32 %v307_v56  ;;  %v358_v9 = vadd.f32 %v357_v4, %v356_v0 }
  0x8c   : > { %732 = vlog2.f32 %v314_v60 }
  0x8d   : > { %734 = vrcp.f32 %v314_v60 }
  0x94   : > { %v729_v7 = vpop.eup %728 }
  0x95   : > { %v731_v10 = vpop.eup %730  ;;  %v360_v11 = vmul.f32 0.6931472, %v729_v7 }
  0x96   : > { %v733_v12 = vpop.eup %732  ;;  %v368_v14 = vmul.f32 %v731_v10, %v351_v6 }
  0x97   : > { %v735_v16 = vpop.eup %734  ;;  %v362_v19 = vmul.f32 0.6931472, %v733_v12  ;;  %v363_v24 = vadd.f32 %v360_v11, %v1088_v15 }
  0x98   : > { %v370_v25 = vmul.f32 %v735_v16, %v358_v9  ;;  %v371_v26 = vsub.f32 1.0, %v368_v14 }
  0x99   : > { %v364_v28 = vadd.f32 %v362_v19, %v1090_v17  ;;  %v365_v31 = vsub.f32 %v363_v24, %v335_v23 }
  0x9a   : > { %v372_v29 = vsub.f32 1.0, %v370_v25  ;;  %v373_v30 = vmax.f32 %v371_v26, 0.0 }
  0x9b   : > { %v366_v35 = vsub.f32 %v364_v28, %v342_v27 }
  0x9c   : > { %v374_v32 = vmax.f32 %v372_v29, 0.0  ;;  %v375_v33 = vmin.f32 %v373_v30, 1.0 }
  0x9e   : > { %v376_v36 = vmin.f32 %v374_v32, 1.0  ;;  %v377_v37 = vmul.f32 %v375_v33, %v375_v33 }
  0xa0   : > { %v378_v38 = vmul.f32 %v376_v36, %v376_v36  ;;  %v379_v39 = vmul.f32 %v377_v37, %v365_v31 }
  0xa2   : > { %v380_v15 = vmul.f32 %v378_v38, %v366_v35  ;;  %v477_v41 = vcombine.low %v377_v37, %v378_v38 }
  0xa4   : > { %v450_v42 = vcombine.low %v379_v39, %v380_v15  ;;  %v484_v43 = vrot.slane %v477_v41, %v456_v40 }
  0xa6   : > { %v457_v17 = vrot.slane %v450_v42, %v456_v40  ;;  %v491_v45 = vrot.slane %v484_v43, %v456_v40 }
  0xa8   : > { %v464_v21 = vrot.slane %v457_v17, %v456_v40  ;;  %v493_v48 = vadd.f32 %v491_v45, %v472_v44 }
  0xaa   : > { %v466_v49 = vadd.f32 %v464_v21, %v445_v46  ;;  %494 = vst.msk [vmem:[#allocation8] sm:$0x3] %vm1112_vm4, %v493_v48 }
  0xab   : > { %809 = shalt.err (!%p806_p10)
}
  0xac   : > { %s810_s22 = scalar_lea.hbm %s1198_s3, 32 }
  0xad   : > { %p811_p11 = scmp.ne.s32.totalorder %s1198_s3, %s810_s22  ;;  %p816_p8 = scmp.lt.u32.totalorder %s810_s22, %s1198_s3 }
  0xaf   : > { %p812_p0 = pnand %p811_p11, %p1118_p9 }
  0xb1   : > { %p813_p12 = pneg %p812_p0 }
  0xb3   : > { %p818_p13 = pnand %p816_p8, %p813_p12 }
  0xb5   : > { %821 = shalt.err (!%p818_p13)
}
  0xb6   : > { %656 = dma.vmem_to_hbm [thread:$0]  (%p1118_p9), %s520_s23, 32, %s1198_s3, [#allocation9]   ;;  %471 = vst.msk [vmem:[#allocation7] sm:$0x3] %vm1112_vm4, %v466_v49 }
  0xb7   : > { %s822_s9 = scalar_lea.vmem %s1124_s12, 32  ;;  %p829_p3 = scmp.lt.s32.totalorder %s1124_s12, %s1124_s12 }
  0xb8   : > { %p823_p7 = scmp.ne.s32.totalorder %s1124_s12, %s822_s9  ;;  %p830_p4 = scmp.lt.s32.totalorder %s822_s9, %s822_s9 }
  0xba   : > { %p824_p6 = pnand %p823_p7, %p1118_p9  ;;  %p831_p1 = por %p830_p4, %p829_p3 }
  0xbc   : > { %p825_p2 = pneg %p824_p6 }
  0xbe   : > { %p832_p5 = pnand %p831_p1, %p825_p2 }
  0xc0   : > { %835 = shalt.err (!%p832_p5)
}
  0xc1   : > { %s836_s7 = scalar_lea.hbm %s1197_s2, 32 }
  0xc2   : > { %p837_p10 = scmp.ne.s32.totalorder %s1197_s2, %s836_s7  ;;  %p842_p12 = scmp.lt.u32.totalorder %s836_s7, %s1197_s2 }
  0xc4   : > { %p838_p11 = pnand %p837_p10, %p1118_p9 }
  0xc6   : > { %p839_p0 = pneg %p838_p11 }
  0xc8   : > { %p844_p8 = pnand %p842_p12, %p839_p0 }
  0xca   : > { %847 = shalt.err (!%p844_p8)
}
  0xcb   : > { %654 = dma.vmem_to_hbm [thread:$0]  (%p1118_p9), %s1124_s12, 32, %s1197_s2, [#allocation4]  }
  0xcc   : > { %881 = dma.done.wait (%p1118_p9), [#allocation4], 32  }
  0xcd   : > { %883 = vsyncadd (%p1118_p9), [#allocation4], 4294967264 }
  0xce   : > { %885 = dma.done.wait (%p1118_p9), [#allocation9], 32  }
  0xcf   : > { %887 = vsyncadd (%p1118_p9), [#allocation9], 4294967264 }
  0xd0 PF: > { %s22_s17 = sadd.s32 1, %s910_s17   ;;  %s1211_s12 = smov %s894_s13 }
  0xd1   : > { %p19_p13 = scmp.ge.s32.totalorder %s22_s17, 4   ;;  %s1212_s13 = smov %s898_s14 }
  0xd2   : > { %s1213_s14 = smov %s989_s24  ;;  %s1214_s15 = smov %s906_s16 }
  0xd3   : > { %s1215_s16 = smov %s1217_s19  ;;  %21 = sbr.rel (!%p19_p13) target bundleno = 8 (0x8), region = 100 }
  0xda   :  { %536 = vsyncpa [#allocation3], 1 }
  0xdb   :  { %538 = vsyncpa [#allocation3 + $0x1], 1 }
  0xdc   :  { %539 = vsyncpa [#allocation6], 1 }
  0xdd   :  { %541 = vsyncpa [#allocation6 + $0x1], 1 }
  0xde   :  { %542 = vsyncpa [#allocation4], 1 }
  0xdf   :  { %544 = vsyncpa [#allocation4 + $0x1], 1 }
  0xe0   :  { %545 = vsyncpa [#allocation9], 1 }

</bundles_post_ra>
